<compile_context>
chip_gen: v5e
topology: v5e:2x2
jax: 0.10.0
libtpu: 0.0.40
codegen_flags: <defaults>
</compile_context>

<pallas_src>
import functools

import jax
import jax.numpy as jnp
from jax.experimental import pallas as pl
from jax.experimental.pallas import tpu as pltpu

_SUBLANE = 8  # sublane width (second-to-last dim granularity)


def _linear_kernel(x_ref, w_ref, b_ref, o_ref):
    # x: [tm, K], w: [K, C] (already transposed), b: [1, C]  -> o: [tm, C]
    y = jnp.dot(x_ref[...], w_ref[...], preferred_element_type=jnp.float32)
    o_ref[...] = (y + b_ref[...]).astype(o_ref.dtype)


def _choose_tiling(B, tm_max):
    """Pick (padded batch, tile rows). tm is always a multiple of 8."""
    Bp = pl.cdiv(B, _SUBLANE) * _SUBLANE
    if Bp <= 512:
        # Small batch: single tile, grid=(1,); per-step overhead dominates anyway.
        return Bp, Bp
    # Medium/large batch: at least 2 grid steps, and an even count, so the
    # "parallel" batch axis shards evenly across both TensorCores on v7x.
    n_steps = max(2, pl.cdiv(Bp, tm_max))
    if n_steps % 2 == 1:
        n_steps += 1
    tm = pl.cdiv(pl.cdiv(Bp, n_steps), _SUBLANE) * _SUBLANE
    Bp = tm * n_steps
    return Bp, tm


@functools.partial(jax.jit, static_argnames=("tm_max",))
def binary_nn_forward(x, weight, bias, *, tm_max=4096):
    """Pallas equivalent of BinaryNN.forward (nn.Linear(in_features=10, out_features=c)).

    x:      [B, K]   (K = 10)
    weight: [C, K]   (PyTorch layout)
    bias:   [C]
    returns [B, C]
    """
    B, K = x.shape
    C, K2 = weight.shape
    assert K == K2
    assert tm_max % _SUBLANE == 0, "tm_max must be a multiple of 8 (sublane width)"

    # Tiny, VMEM-resident operands: pre-transpose W once (no in-kernel .T / relayout).
    w_t = weight.T.astype(jnp.float32)            # [K, C]
    b2 = bias.astype(jnp.float32).reshape(1, C)   # [1, C]

    # Pad only the batch rows to the tiling; feature/class dims stay at true width.
    Bp, tm = _choose_tiling(B, tm_max)
    xf = x.astype(jnp.float32)
    if Bp != B:
        xf = jnp.pad(xf, ((0, Bp - B), (0, 0)))

    grid = (Bp // tm,)
    out = pl.pallas_call(
        _linear_kernel,
        out_shape=jax.ShapeDtypeStruct((Bp, C), jnp.float32),
        grid=grid,
        in_specs=[
            # X streamed over the batch at true width K (last block dim == full dim).
            pl.BlockSpec((tm, K), lambda i: (i, 0)),
            # W / bias: constant index_map -> VMEM-resident across grid steps.
            pl.BlockSpec((K, C), lambda i: (0, 0)),
            pl.BlockSpec((1, C), lambda i: (0, 0)),
        ],
        out_specs=pl.BlockSpec((tm, C), lambda i: (i, 0)),
        compiler_params=pltpu.CompilerParams(
            dimension_semantics=("parallel",),   # 2-TC sharding on v7x, free elsewhere
        ),
    )(xf, w_t, b2)

    # Strip only the batch-row padding (under jit this fuses with the call).
    return out[:B].astype(x.dtype)


def init_params(key, c, in_features=10):
    # Mimic PyTorch nn.Linear default init: U(-1/sqrt(fan_in), 1/sqrt(fan_in)).
    kw, kb = jax.random.split(key)
    bound = 1.0 / jnp.sqrt(jnp.float32(in_features))
    weight = jax.random.uniform(kw, (c, in_features), jnp.float32, -bound, bound)
    bias = jax.random.uniform(kb, (c,), jnp.float32, -bound, bound)
    return weight, bias


if __name__ == "__main__":
    key = jax.random.PRNGKey(0)
    k_x, k_p, k_x2 = jax.random.split(key, 3)

    in_features = 10   # fixed by nn.Linear(10, c)
    num_classes = 16   # "c" in BinaryNN(c)

    # Small case (single-tile path, grid=(1,)).
    batch = 8
    x = jax.random.normal(k_x, (batch, in_features), jnp.float32)
    weight, bias = init_params(k_p, num_classes, in_features)

    out = jax.block_until_ready(binary_nn_forward(x, weight, bias))
    ref = x @ weight.T + bias
    assert out.shape == (batch, num_classes)
    assert jnp.allclose(out, ref, atol=1e-5, rtol=1e-5)

    # Larger, non-multiple batch (exercises the even multi-step grid + row padding).
    batch2 = 2056
    x2 = jax.random.normal(k_x2, (batch2, in_features), jnp.float32)
    out2 = jax.block_until_ready(binary_nn_forward(x2, weight, bias))
    ref2 = x2 @ weight.T + bias
    assert out2.shape == (batch2, num_classes)
    assert jnp.allclose(out2, ref2, atol=1e-5, rtol=1e-5)

    print("KERNEL_OK")
</pallas_src>

<mosaic_0001>
module attributes {stable_mosaic.version = 11 : i64} {
  func.func @_linear_kernel(%arg0: i32, %arg1: memref<8x10xf32, #tpu.memory_space<vmem>>, %arg2: memref<10x16xf32, #tpu.memory_space<vmem>>, %arg3: memref<1x16xf32, #tpu.memory_space<vmem>>, %arg4: memref<8x16xf32, #tpu.memory_space<vmem>>) attributes {dimension_semantics = [#tpu.dimension_semantics<parallel>], iteration_bounds = array<i64: 1>, scalar_prefetch = 0 : i64, scratch_operands = 0 : i64, tpu.core_type = #tpu.core_type<tc>, window_params = [{transform_indices = @transform_0, window_bounds = array<i64: 8, 10>}, {pipeline_mode = #tpu.pipeline_mode<synchronous>, transform_indices = @transform_1, window_bounds = array<i64: 10, 16>}, {pipeline_mode = #tpu.pipeline_mode<synchronous>, transform_indices = @transform_2, window_bounds = array<i64: 1, 16>}, {transform_indices = @transform_3, window_bounds = array<i64: 8, 16>}]} {
    %c0 = arith.constant 0 : index
    %c0_0 = arith.constant 0 : index
    %0 = vector.load %arg1[%c0, %c0_0] : memref<8x10xf32, #tpu.memory_space<vmem>>, vector<8x10xf32>
    %c0_1 = arith.constant 0 : index
    %c0_2 = arith.constant 0 : index
    %1 = vector.load %arg2[%c0_1, %c0_2] : memref<10x16xf32, #tpu.memory_space<vmem>>, vector<10x16xf32>
    %cst = arith.constant dense<0.000000e+00> : vector<8x16xf32>
    %2 = tpu.matmul %0, %1, %cst {dimension_numbers = #tpu.dot_dimension_numbers<[1], [0], [0], [1], [0, 0, 1, 1], [], []>} : vector<8x10xf32>, vector<10x16xf32>, vector<8x16xf32> -> vector<8x16xf32>
    %c0_3 = arith.constant 0 : index
    %c0_4 = arith.constant 0 : index
    %3 = vector.load %arg3[%c0_3, %c0_4] : memref<1x16xf32, #tpu.memory_space<vmem>>, vector<1x16xf32>
    %4 = vector.broadcast %3 : vector<1x16xf32> to vector<8x16xf32>
    %5 = arith.addf %2, %4 : vector<8x16xf32>
    %c0_5 = arith.constant 0 : index
    %c0_6 = arith.constant 0 : index
    %6 = vector.load %arg4[%c0_5, %c0_6] : memref<8x16xf32, #tpu.memory_space<vmem>>, vector<8x16xf32>
    tpu.vector_store %arg4[%c0_5, %c0_6], %5 {strides = array<i32>} : memref<8x16xf32, #tpu.memory_space<vmem>>, vector<8x16xf32>,
    return
  }
  func.func @transform_0(%arg0: i32) -> (i32, i32) {
    %c0_i32 = arith.constant 0 : i32
    %c0_i32_0 = arith.constant 0 : i32
    return %arg0, %c0_i32 : i32, i32
  }
  func.func @transform_1(%arg0: i32) -> (i32, i32) {
    %c0_i32 = arith.constant 0 : i32
    %c0_i32_0 = arith.constant 0 : i32
    %c0_i32_1 = arith.constant 0 : i32
    return %c0_i32, %c0_i32_0 : i32, i32
  }
  func.func @transform_2(%arg0: i32) -> (i32, i32) {
    %c0_i32 = arith.constant 0 : i32
    %c0_i32_0 = arith.constant 0 : i32
    %c0_i32_1 = arith.constant 0 : i32
    return %c0_i32, %c0_i32_0 : i32, i32
  }
  func.func @transform_3(%arg0: i32) -> (i32, i32) {
    %c0_i32 = arith.constant 0 : i32
    %c0_i32_0 = arith.constant 0 : i32
    return %arg0, %c0_i32 : i32, i32
  }
}

</mosaic_0001>

<bundles_post_ra>
// kernel: binary_nn_forward.1
= control target key start
LH: loop header
LB: loop body
LE: loop exit
PB: predicated region body
PF: predicated region fallthrough
CT: control target
= control target key end

     0   :  { %vm26_vm0 = vcmask 1041408   ;;  %vm22_vm1 = vcmask 80896   ;;  %s134_s0 = inlined_call_operand.vmem [shape: f32[8,10], index: 0, kind: input, shape index: {}]   ;;  %s135_s1 = inlined_call_operand.vmem [shape: f32[10,16], index: 1, kind: input, shape index: {}]   ;;  %s136_s2 = inlined_call_operand.vmem [shape: f32[1,16], index: 2, kind: input, shape index: {}]   ;;  %s137_s3 = inlined_call_operand.hbm [shape: f32[8,16], index: 3, kind: output, shape index: {}]  }
   0x1   :  { %v17_v0 = vld [vmem:[%s135_s1 + $0x8] sm:$0x3]  ;;  %v16_v1 = vld [vmem:[%s135_s1] sm:$0xff] }
   0x2   :  { %68 = vmatpush.msk.msra.mxu0 %vm26_vm0, %v17_v0  ;;  %v15_v2 = vld [vmem:[%s134_s0] sm:$0xff] }
   0x3   :  { %8 = vsyncpa [#allocation3], 0  ;;  %v71_v3 = vld [vmem:[%s136_s2] ss:$0 sm:$0xff]  ;;  %s98_s20 = smov [#allocation2]   ;;  %s59_s24 = sshll.u32 %s137_s3, 4  ;;  %s60_s24 = int_to_ptr.hbm [resolvable:$true] %s59_s24 }
   0x4   :  { %45 = vmatpush.msra.mxu0 %v16_v1  ;;  %s57_s21 = sshll.u32 %s98_s20, 4  ;;  %vm50_vm2 = vcmask 130048   ;;  %s58_s21 = int_to_ptr.vmem [resolvable:$true] %s57_s21 }
   0x5   :  { %69 = vmatmul.msk.f32.vlgmr.msra.gmra.mxu0 %vm22_vm1, %v15_v2 }
  0x82   :  { %v47_v4 = vpop.f32.mrf.mxu0 }
  0x83   :  { %v48_v5 = vadd.f32 %v71_v3, %v47_v4 }
  0x85   :  { %51 = vst.msk [vmem:[#allocation2] sm:$0xff] %vm50_vm2, %v48_v5 }
  0x86   :  { %62 = dma.vmem_to_hbm [thread:$0]  %s58_s21, 128, %s60_s24, [#allocation3]  }
  0x87   :  { %96 = dma.done.wait [#allocation3], 128  }
  0x88   :  { %97 = vsyncadd [#allocation3], 4294967168 }
  0x89   :  { %67 = vsyncpa [#allocation3], 1 }

</bundles_post_ra>
